<compile_context>
chip_gen: v7x
topology: tpu7x:2x2x1
jax: 0.10.0
libtpu: 0.0.40
codegen_flags: <defaults>
</compile_context>

<pallas_src>
import functools

import jax
import jax.numpy as jnp
from jax.experimental import pallas as pl
from jax.experimental.pallas import tpu as pltpu

INPUT_SIZE = 16
HIDDEN_SIZE = 128
OUTPUT_SIZE = 4

TB_MAX = 2048      # max batch-tile rows
TB_MIN = 256       # smallest tile the divisor search will accept
SUBLANE = 16       # bf16 native sublane packing (also satisfies f32's 8)


def _cdiv(a, b):
    return -(-a // b)


def _round_up(v, m):
    return ((v + m - 1) // m) * m


def _pick_act_dtype():
    """Elementwise (bias-add / tanh) dtype: bf16 on v6e/v7x (native bf16
    VPU/EUP), f32 on v5e and anything unknown. MXU operands are bf16 on
    every generation (accumulation always f32)."""
    try:
        kind = jax.devices()[0].device_kind.lower()
    except Exception:
        return jnp.float32
    if ("v6" in kind) or ("v7" in kind):
        return jnp.bfloat16
    return jnp.float32


def _choose_batch_tile(batch):
    """Pick (tile_rows, padded_batch).

    Big tiles amortize the ~0.35us/step grid overhead; >=2 steps keeps
    input/output pipelining and v7x megacore sharding alive; a tile that
    divides the (16-row-aligned) batch avoids materializing a padded copy
    of x in the wrapper."""
    padded = _round_up(batch, SUBLANE)
    if padded <= TB_MAX:
        half = padded // 2
        if half >= TB_MIN and half % SUBLANE == 0:
            return half, padded            # 2 steps, no extra padding
        return padded, padded              # small batch: single tile
    # Largest tile <= TB_MAX (and <= padded//2 so we keep >= 2 steps) that
    # exactly divides the aligned batch -> no wrapper-side jnp.pad of x.
    upper = (min(TB_MAX, padded // 2) // SUBLANE) * SUBLANE
    for tb in range(upper, TB_MIN - 1, -SUBLANE):
        if padded % tb == 0:
            return tb, padded
    # Fallback: near-equal tiles, accept a small pad of the last tile.
    steps = max(2, _cdiv(padded, TB_MAX))
    tb = _round_up(_cdiv(padded, steps), SUBLANE)
    return tb, _round_up(batch, tb)


def trunk_mlp_kernel(x_ref,
                     w1_ref, b1_ref,
                     w2_ref, b2_ref,
                     w3_ref, b3_ref,
                     w4_ref, b4_ref,
                     w5_ref, b5_ref,
                     o_ref, *, act_dtype):
    """All five linear layers + tanh fused; one batch tile per grid step.

    Weights are stored (in_features, out_features) so `x @ W + b` matches
    PyTorch's `x @ weight.T + bias`. Dots use bf16 operands with f32 MXU
    accumulation; bias add in f32; tanh in `act_dtype` on the EUP."""
    mxu_dtype = w1_ref.dtype
    # In-kernel cast: x is read from HBM once as f32; the cast is a cheap VPU op.
    h = x_ref[...].astype(mxu_dtype)

    def layer(h, w_ref, b_ref):
        acc = jnp.dot(h, w_ref[...], preferred_element_type=jnp.float32) + b_ref[...]
        return jnp.tanh(acc.astype(act_dtype)).astype(mxu_dtype)

    h = layer(h, w1_ref, b1_ref)   # fc1 + tanh
    h = layer(h, w2_ref, b2_ref)   # fc2 + tanh
    h = layer(h, w3_ref, b3_ref)   # fc3 + tanh
    h = layer(h, w4_ref, b4_ref)   # fc4 + tanh
    # fc5 (no activation): narrow (tb, 4) store -> only the real 16 B/row hit HBM.
    o_ref[...] = (jnp.dot(h, w5_ref[...], preferred_element_type=jnp.float32)
                  + b5_ref[...]).astype(o_ref.dtype)


def prepare_params(params, mxu_dtype=jnp.bfloat16):
    """One-time prep (hoisted out of the hot path): weights -> bf16 for the
    MXU, biases kept f32 (added post-MXU in f32)."""
    return tuple((jnp.asarray(w, mxu_dtype), jnp.asarray(b, jnp.float32))
                 for (w, b) in params)


@functools.partial(jax.jit, static_argnames=("act_dtype",))
def trunk_network_forward(x, prepared_params, act_dtype=jnp.float32):
    """x: (batch, input_size) f32; prepared_params: 5x (W bf16 (in,out), b f32 (1,out))."""
    batch, in_dim = x.shape
    tb, padded_batch = _choose_batch_tile(batch)
    if padded_batch != batch:
        x = jnp.pad(x, ((0, padded_batch - batch), (0, 0)))
    grid = (padded_batch // tb,)

    in_specs = [pl.BlockSpec((tb, in_dim), lambda i: (i, 0))]
    flat_args = [x]
    for w, b in prepared_params:
        flat_args.extend([w, b])
        # Constant index_maps: weights/biases are DMA'd once and stay VMEM-resident.
        in_specs.append(pl.BlockSpec(w.shape, lambda i: (0, 0)))
        in_specs.append(pl.BlockSpec(b.shape, lambda i: (0, 0)))

    out_specs = pl.BlockSpec((tb, OUTPUT_SIZE), lambda i: (i, 0))
    out_shape = jax.ShapeDtypeStruct((padded_batch, OUTPUT_SIZE), jnp.float32)

    out = pl.pallas_call(
        functools.partial(trunk_mlp_kernel, act_dtype=act_dtype),
        grid=grid,
        out_shape=out_shape,
        in_specs=in_specs,
        out_specs=out_specs,
        compiler_params=pltpu.CompilerParams(
            dimension_semantics=("parallel",),   # batch axis: megacore-shardable
        ),
    )(*flat_args)

    if padded_batch != batch:
        out = out[:batch]
    return out


def init_params(key, input_size, hidden_size, output_size):
    """PyTorch-like uniform(-1/sqrt(fan_in), 1/sqrt(fan_in)) init.
    Weights stored as (in_features, out_features); biases as (1, out_features)."""
    dims = [
        (input_size, hidden_size),             # fc1
        (hidden_size, hidden_size // 2),       # fc2
        (hidden_size // 2, hidden_size // 2),  # fc3
        (hidden_size // 2, hidden_size // 2),  # fc4
        (hidden_size // 2, output_size),       # fc5
    ]
    params = []
    for (fan_in, fan_out) in dims:
        key, kw, kb = jax.random.split(key, 3)
        bound = 1.0 / jnp.sqrt(jnp.float32(fan_in))
        w = jax.random.uniform(kw, (fan_in, fan_out), jnp.float32, -bound, bound)
        b = jax.random.uniform(kb, (1, fan_out), jnp.float32, -bound, bound)
        params.append((w, b))
    return params


def reference_forward(x, params):
    """Pure-JAX f32 reference of the PyTorch forward pass."""
    h = x
    for i, (w, b) in enumerate(params):
        h = h @ w + b
        if i < len(params) - 1:
            h = jnp.tanh(h)
    return h


if __name__ == "__main__":
    key = jax.random.PRNGKey(0)
    batch = 8   # tiny demo batch; the kernel pays off at large batch

    key, kx = jax.random.split(key)
    x = jax.random.normal(kx, (batch, INPUT_SIZE), jnp.float32)

    raw_params = init_params(key, INPUT_SIZE, HIDDEN_SIZE, OUTPUT_SIZE)

    act_dtype = _pick_act_dtype()
    prepared = prepare_params(raw_params)        # one-time prep, outside the hot path

    out = trunk_network_forward(x, prepared, act_dtype=act_dtype)
    out = jax.block_until_ready(out)

    ref = reference_forward(x, raw_params)
    assert out.shape == (batch, OUTPUT_SIZE), out.shape

    # bf16 MXU operands on every generation -> loose tolerance (accumulation and
    # bias-add stay f32; tanh is bf16 only on v6e/v7x).
    atol, rtol = 1e-1, 5e-2
    err = jnp.max(jnp.abs(out - ref))
    assert jnp.allclose(out, ref, atol=atol, rtol=rtol), f"max abs err = {err}"

    print("KERNEL_OK")
</pallas_src>

<mosaic_0001>
module attributes {stable_mosaic.version = 11 : i64} {
  func.func @trunk_mlp_kernel(%arg0: i32, %arg1: memref<16x16xf32, #tpu.memory_space<vmem>>, %arg2: memref<16x128xbf16, #tpu.memory_space<vmem>>, %arg3: memref<1x128xf32, #tpu.memory_space<vmem>>, %arg4: memref<128x64xbf16, #tpu.memory_space<vmem>>, %arg5: memref<1x64xf32, #tpu.memory_space<vmem>>, %arg6: memref<64x64xbf16, #tpu.memory_space<vmem>>, %arg7: memref<1x64xf32, #tpu.memory_space<vmem>>, %arg8: memref<64x64xbf16, #tpu.memory_space<vmem>>, %arg9: memref<1x64xf32, #tpu.memory_space<vmem>>, %arg10: memref<64x4xbf16, #tpu.memory_space<vmem>>, %arg11: memref<1x4xf32, #tpu.memory_space<vmem>>, %arg12: memref<16x4xf32, #tpu.memory_space<vmem>>) attributes {dimension_semantics = [#tpu.dimension_semantics<parallel>], iteration_bounds = array<i64: 1>, scalar_prefetch = 0 : i64, scratch_operands = 0 : i64, tpu.core_type = #tpu.core_type<tc>, window_params = [{transform_indices = @transform_0, window_bounds = array<i64: 16, 16>}, {pipeline_mode = #tpu.pipeline_mode<synchronous>, transform_indices = @transform_1, window_bounds = array<i64: 16, 128>}, {pipeline_mode = #tpu.pipeline_mode<synchronous>, transform_indices = @transform_2, window_bounds = array<i64: 1, 128>}, {pipeline_mode = #tpu.pipeline_mode<synchronous>, transform_indices = @transform_3, window_bounds = array<i64: 128, 64>}, {pipeline_mode = #tpu.pipeline_mode<synchronous>, transform_indices = @transform_4, window_bounds = array<i64: 1, 64>}, {pipeline_mode = #tpu.pipeline_mode<synchronous>, transform_indices = @transform_5, window_bounds = array<i64: 64, 64>}, {pipeline_mode = #tpu.pipeline_mode<synchronous>, transform_indices = @transform_6, window_bounds = array<i64: 1, 64>}, {pipeline_mode = #tpu.pipeline_mode<synchronous>, transform_indices = @transform_7, window_bounds = array<i64: 64, 64>}, {pipeline_mode = #tpu.pipeline_mode<synchronous>, transform_indices = @transform_8, window_bounds = array<i64: 1, 64>}, {pipeline_mode = #tpu.pipeline_mode<synchronous>, transform_indices = @transform_9, window_bounds = array<i64: 64, 4>}, {pipeline_mode = #tpu.pipeline_mode<synchronous>, transform_indices = @transform_10, window_bounds = array<i64: 1, 4>}, {transform_indices = @transform_11, window_bounds = array<i64: 16, 4>}]} {
    %c0 = arith.constant 0 : index
    %c0_0 = arith.constant 0 : index
    %0 = vector.load %arg1[%c0, %c0_0] : memref<16x16xf32, #tpu.memory_space<vmem>>, vector<16x16xf32>
    %1 = arith.truncf %0 : vector<16x16xf32> to vector<16x16xbf16>
    %c0_1 = arith.constant 0 : index
    %c0_2 = arith.constant 0 : index
    %2 = vector.load %arg2[%c0_1, %c0_2] : memref<16x128xbf16, #tpu.memory_space<vmem>>, vector<16x128xbf16>
    %cst = arith.constant dense<0.000000e+00> : vector<16x128xf32>
    %3 = tpu.matmul %1, %2, %cst {dimension_numbers = #tpu.dot_dimension_numbers<[1], [0], [0], [1], [0, 0, 1, 1], [], []>} : vector<16x16xbf16>, vector<16x128xbf16>, vector<16x128xf32> -> vector<16x128xf32>
    %c0_3 = arith.constant 0 : index
    %c0_4 = arith.constant 0 : index
    %4 = vector.load %arg3[%c0_3, %c0_4] : memref<1x128xf32, #tpu.memory_space<vmem>>, vector<1x128xf32>
    %5 = vector.broadcast %4 : vector<1x128xf32> to vector<16x128xf32>
    %6 = arith.addf %3, %5 : vector<16x128xf32>
    %7 = math.tanh %6 : vector<16x128xf32>
    %8 = arith.truncf %7 : vector<16x128xf32> to vector<16x128xbf16>
    %c0_5 = arith.constant 0 : index
    %c0_6 = arith.constant 0 : index
    %9 = vector.load %arg4[%c0_5, %c0_6] : memref<128x64xbf16, #tpu.memory_space<vmem>>, vector<128x64xbf16>
    %cst_7 = arith.constant dense<0.000000e+00> : vector<16x64xf32>
    %10 = tpu.matmul %8, %9, %cst_7 {dimension_numbers = #tpu.dot_dimension_numbers<[1], [0], [0], [1], [0, 0, 1, 1], [], []>} : vector<16x128xbf16>, vector<128x64xbf16>, vector<16x64xf32> -> vector<16x64xf32>
    %c0_8 = arith.constant 0 : index
    %c0_9 = arith.constant 0 : index
    %11 = vector.load %arg5[%c0_8, %c0_9] : memref<1x64xf32, #tpu.memory_space<vmem>>, vector<1x64xf32>
    %12 = vector.broadcast %11 : vector<1x64xf32> to vector<16x64xf32>
    %13 = arith.addf %10, %12 : vector<16x64xf32>
    %14 = math.tanh %13 : vector<16x64xf32>
    %15 = arith.truncf %14 : vector<16x64xf32> to vector<16x64xbf16>
    %c0_10 = arith.constant 0 : index
    %c0_11 = arith.constant 0 : index
    %16 = vector.load %arg6[%c0_10, %c0_11] : memref<64x64xbf16, #tpu.memory_space<vmem>>, vector<64x64xbf16>
    %cst_12 = arith.constant dense<0.000000e+00> : vector<16x64xf32>
    %17 = tpu.matmul %15, %16, %cst_12 {dimension_numbers = #tpu.dot_dimension_numbers<[1], [0], [0], [1], [0, 0, 1, 1], [], []>} : vector<16x64xbf16>, vector<64x64xbf16>, vector<16x64xf32> -> vector<16x64xf32>
    %c0_13 = arith.constant 0 : index
    %c0_14 = arith.constant 0 : index
    %18 = vector.load %arg7[%c0_13, %c0_14] : memref<1x64xf32, #tpu.memory_space<vmem>>, vector<1x64xf32>
    %19 = vector.broadcast %18 : vector<1x64xf32> to vector<16x64xf32>
    %20 = arith.addf %17, %19 : vector<16x64xf32>
    %21 = math.tanh %20 : vector<16x64xf32>
    %22 = arith.truncf %21 : vector<16x64xf32> to vector<16x64xbf16>
    %c0_15 = arith.constant 0 : index
    %c0_16 = arith.constant 0 : index
    %23 = vector.load %arg8[%c0_15, %c0_16] : memref<64x64xbf16, #tpu.memory_space<vmem>>, vector<64x64xbf16>
    %cst_17 = arith.constant dense<0.000000e+00> : vector<16x64xf32>
    %24 = tpu.matmul %22, %23, %cst_17 {dimension_numbers = #tpu.dot_dimension_numbers<[1], [0], [0], [1], [0, 0, 1, 1], [], []>} : vector<16x64xbf16>, vector<64x64xbf16>, vector<16x64xf32> -> vector<16x64xf32>
    %c0_18 = arith.constant 0 : index
    %c0_19 = arith.constant 0 : index
    %25 = vector.load %arg9[%c0_18, %c0_19] : memref<1x64xf32, #tpu.memory_space<vmem>>, vector<1x64xf32>
    %26 = vector.broadcast %25 : vector<1x64xf32> to vector<16x64xf32>
    %27 = arith.addf %24, %26 : vector<16x64xf32>
    %28 = math.tanh %27 : vector<16x64xf32>
    %29 = arith.truncf %28 : vector<16x64xf32> to vector<16x64xbf16>
    %c0_20 = arith.constant 0 : index
    %c0_21 = arith.constant 0 : index
    %30 = vector.load %arg10[%c0_20, %c0_21] : memref<64x4xbf16, #tpu.memory_space<vmem>>, vector<64x4xbf16>
    %cst_22 = arith.constant dense<0.000000e+00> : vector<16x4xf32>
    %31 = tpu.matmul %29, %30, %cst_22 {dimension_numbers = #tpu.dot_dimension_numbers<[1], [0], [0], [1], [0, 0, 1, 1], [], []>} : vector<16x64xbf16>, vector<64x4xbf16>, vector<16x4xf32> -> vector<16x4xf32>
    %c0_23 = arith.constant 0 : index
    %c0_24 = arith.constant 0 : index
    %32 = vector.load %arg11[%c0_23, %c0_24] : memref<1x4xf32, #tpu.memory_space<vmem>>, vector<1x4xf32>
    %33 = vector.broadcast %32 : vector<1x4xf32> to vector<16x4xf32>
    %34 = arith.addf %31, %33 : vector<16x4xf32>
    %c0_25 = arith.constant 0 : index
    %c0_26 = arith.constant 0 : index
    %35 = vector.load %arg12[%c0_25, %c0_26] : memref<16x4xf32, #tpu.memory_space<vmem>>, vector<16x4xf32>
    tpu.vector_store %arg12[%c0_25, %c0_26], %34 {strides = array<i32>} : memref<16x4xf32, #tpu.memory_space<vmem>>, vector<16x4xf32>,
    return
  }
  func.func @transform_0(%arg0: i32) -> (i32, i32) {
    %c0_i32 = arith.constant 0 : i32
    %c0_i32_0 = arith.constant 0 : i32
    return %arg0, %c0_i32 : i32, i32
  }
  func.func @transform_1(%arg0: i32) -> (i32, i32) {
    %c0_i32 = arith.constant 0 : i32
    %c0_i32_0 = arith.constant 0 : i32
    %c0_i32_1 = arith.constant 0 : i32
    return %c0_i32, %c0_i32_0 : i32, i32
  }
  func.func @transform_2(%arg0: i32) -> (i32, i32) {
    %c0_i32 = arith.constant 0 : i32
    %c0_i32_0 = arith.constant 0 : i32
    %c0_i32_1 = arith.constant 0 : i32
    return %c0_i32, %c0_i32_0 : i32, i32
  }
  func.func @transform_3(%arg0: i32) -> (i32, i32) {
    %c0_i32 = arith.constant 0 : i32
    %c0_i32_0 = arith.constant 0 : i32
    %c0_i32_1 = arith.constant 0 : i32
    return %c0_i32, %c0_i32_0 : i32, i32
  }
  func.func @transform_4(%arg0: i32) -> (i32, i32) {
    %c0_i32 = arith.constant 0 : i32
    %c0_i32_0 = arith.constant 0 : i32
    %c0_i32_1 = arith.constant 0 : i32
    return %c0_i32, %c0_i32_0 : i32, i32
  }
  func.func @transform_5(%arg0: i32) -> (i32, i32) {
    %c0_i32 = arith.constant 0 : i32
    %c0_i32_0 = arith.constant 0 : i32
    %c0_i32_1 = arith.constant 0 : i32
    return %c0_i32, %c0_i32_0 : i32, i32
  }
  func.func @transform_6(%arg0: i32) -> (i32, i32) {
    %c0_i32 = arith.constant 0 : i32
    %c0_i32_0 = arith.constant 0 : i32
    %c0_i32_1 = arith.constant 0 : i32
    return %c0_i32, %c0_i32_0 : i32, i32
  }
  func.func @transform_7(%arg0: i32) -> (i32, i32) {
    %c0_i32 = arith.constant 0 : i32
    %c0_i32_0 = arith.constant 0 : i32
    %c0_i32_1 = arith.constant 0 : i32
    return %c0_i32, %c0_i32_0 : i32, i32
  }
  func.func @transform_8(%arg0: i32) -> (i32, i32) {
    %c0_i32 = arith.constant 0 : i32
    %c0_i32_0 = arith.constant 0 : i32
    %c0_i32_1 = arith.constant 0 : i32
    return %c0_i32, %c0_i32_0 : i32, i32
  }
  func.func @transform_9(%arg0: i32) -> (i32, i32) {
    %c0_i32 = arith.constant 0 : i32
    %c0_i32_0 = arith.constant 0 : i32
    %c0_i32_1 = arith.constant 0 : i32
    return %c0_i32, %c0_i32_0 : i32, i32
  }
  func.func @transform_10(%arg0: i32) -> (i32, i32) {
    %c0_i32 = arith.constant 0 : i32
    %c0_i32_0 = arith.constant 0 : i32
    %c0_i32_1 = arith.constant 0 : i32
    return %c0_i32, %c0_i32_0 : i32, i32
  }
  func.func @transform_11(%arg0: i32) -> (i32, i32) {
    %c0_i32 = arith.constant 0 : i32
    %c0_i32_0 = arith.constant 0 : i32
    return %arg0, %c0_i32 : i32, i32
  }
}

</mosaic_0001>

<bundles_post_ra>
// kernel: trunk_network_forward.1
= control target key start
LH: loop header
LB: loop body
LE: loop exit
PB: predicated region body
PF: predicated region fallthrough
CT: control target
= control target key end

     0   :  { %v640_v0 = vmov 0.0   ;;  %vm641_vm0 = vmmov 0   ;;  %vm57_vm1 = vcmask 130048   ;;  %vm259_vm2 = vcmask 523264   ;;  %s826_s1 = inlined_call_operand.vmem [shape: bf16[16,128], index: 1, kind: input, shape index: {}]   ;;  %s827_s0 = inlined_call_operand.vmem [shape: f32[16,16], index: 0, kind: input, shape index: {}]   ;;  %s828_s3 = inlined_call_operand.vmem [shape: bf16[128,64], index: 3, kind: input, shape index: {}]   ;;  %s829_s2 = inlined_call_operand.vmem [shape: f32[1,128], index: 2, kind: input, shape index: {}]   ;;  %s830_s5 = inlined_call_operand.vmem [shape: bf16[64,64], index: 5, kind: input, shape index: {}]   ;;  %s831_s4 = inlined_call_operand.vmem [shape: f32[1,64], index: 4, kind: input, shape index: {}]   ;;  %s832_s7 = inlined_call_operand.vmem [shape: bf16[64,64], index: 7, kind: input, shape index: {}]   ;;  %s833_s6 = inlined_call_operand.vmem [shape: f32[1,64], index: 6, kind: input, shape index: {}]   ;;  %s834_s9 = inlined_call_operand.vmem [shape: bf16[64,4], index: 9, kind: input, shape index: {}]   ;;  %s835_s8 = inlined_call_operand.vmem [shape: f32[1,64], index: 8, kind: input, shape index: {}]   ;;  %s836_s10 = inlined_call_operand.vmem [shape: f32[1,4], index: 10, kind: input, shape index: {}]   ;;  %s837_s11 = inlined_call_operand.vmem [shape: f32[16,4], index: 11, kind: output, shape index: {}]  }
   0x1   :  { %539 = vmatprep.subr.bf16.mxu0 %v640_v0  ;;  %v603_v1 = vld [vmem:[%s826_s1] sm:$0xff]   ;;  %541 = vmatprep.mubr.msk.bf16.mxu0 %vm641_vm0, %v640_v0  ;;  %v40_v3 = vld [vmem:[%s827_s0 + $0x8] sm:$0xff]  ;;  %v606_v7 = vld [vmem:[%s828_s3 + $0x10] sm:$0xff]   ;;  %vm476_vm3 = vcmask 31744  }
   0x2   :  { %v39_v2 = vld [vmem:[%s827_s0] sm:$0xff]  ;;  %545 = vmatprep.subr.bf16.mxu1 %v640_v0  ;;  %561 = vmatprep.mubr.msk.bf16.mxu1 %vm641_vm0, %v640_v0  ;;  %v605_v6 = vld [vmem:[%s828_s3 + $0x8] sm:$0xff]   ;;  %v607_v8 = vld [vmem:[%s828_s3 + $0x18] sm:$0xff]  }
   0x3   :  { %540 = vmatpush3.bf16.msra.mxu0 %v603_v1  ;;  %v41_v4 = vpack.c.bf16 %v40_v3, %v39_v2  ;;  %v604_v5 = vld [vmem:[%s828_s3] sm:$0xff]   ;;  %v609_v10 = vld [vmem:[%s828_s3 + $0x28] sm:$0xff]   ;;  %v610_v11 = vld [vmem:[%s828_s3 + $0x30] sm:$0xff]  }
   0x4   :  { %565 = vmatprep.subr.bf16.mxu0 %v640_v0  ;;  %546 = vmatpush3.bf16.msra.mxu1 %v604_v5  ;;  %v608_v9 = vld [vmem:[%s828_s3 + $0x20] sm:$0xff]   ;;  %v611_v12 = vld [vmem:[%s828_s3 + $0x38] sm:$0xff]   ;;  %v613_v24 = vld [vmem:[%s830_s5 + $0x8] sm:$0xff]  }
   0x5   :  { %547 = vmatprep.subr.bf16.mxu1 %v640_v0  ;;  %v483_v13 = vld [vmem:[%s829_s2] ss:$0 sm:$0xff]  ;;  %v614_v25 = vld [vmem:[%s830_s5 + $0x10] sm:$0xff]   ;;  %v615_v26 = vld [vmem:[%s830_s5 + $0x18] sm:$0xff]  }
   0x6   :  { %542 = vmatmul.mubr.msk.bf16.vlgmr.msra.gmra.mrb[0].mxu0 %vm57_vm1, %v41_v4  ;;  %v612_v23 = vld [vmem:[%s830_s5] sm:$0xff]   ;;  %v617_v38 = vld [vmem:[%s832_s7 + $0x8] sm:$0xff]   ;;  %v618_v39 = vld [vmem:[%s832_s7 + $0x10] sm:$0xff]  }
   0x7   :  { %573 = vmatprep.mubr.msk.bf16.mxu0 %vm641_vm0, %v640_v0  ;;  %566 = vmatpush3.bf16.msra.mxu0 %v612_v23  ;;  %v486_v27 = vld [vmem:[%s831_s4] ss:$0 sm:$0xff]  ;;  %v619_v40 = vld [vmem:[%s832_s7 + $0x18] sm:$0xff]   ;;  %v621_v52 = vld [vmem:[%s834_s9 + $0x8] sm:$0xff]  }
   0x8   :  { %548 = vmatpush3.bf16.msra.mxu1 %v605_v6  ;;  %567 = vmatprep.subr.bf16.mxu0 %v640_v0  ;;  %v616_v37 = vld [vmem:[%s832_s7] sm:$0xff]   ;;  %v622_v53 = vld [vmem:[%s834_s9 + $0x10] sm:$0xff]   ;;  %v623_v54 = vld [vmem:[%s834_s9 + $0x18] sm:$0xff]  }
   0x9   :  { %549 = vmatprep.subr.bf16.mxu1 %v640_v0  ;;  %v495_v41 = vld [vmem:[%s833_s6] ss:$0 sm:$0xff] }
   0xa   :  { %v620_v51 = vld [vmem:[%s834_s9] sm:$0xff]  }
   0xb   :  { %568 = vmatpush3.bf16.msra.mxu0 %v613_v24  ;;  %v501_v55 = vld [vmem:[%s835_s8] ss:$0 sm:$0xff] }
   0xc   :  { %550 = vmatpush3.bf16.msra.mxu1 %v606_v7  ;;  %569 = vmatprep.subr.bf16.mxu0 %v640_v0 }
   0xd   :  { %551 = vmatprep.subr.bf16.mxu1 %v640_v0 }
   0xf   :  { %570 = vmatpush3.bf16.msra.mxu0 %v614_v25 }
  0x10   :  { %552 = vmatpush3.bf16.msra.mxu1 %v607_v8  ;;  %571 = vmatprep.subr.bf16.mxu0 %v640_v0 }
  0x11   :  { %553 = vmatprep.subr.bf16.mxu1 %v640_v0 }
  0x13   :  { %572 = vmatpush3.bf16.msra.mxu0 %v615_v26 }
  0x14   :  { %554 = vmatpush3.bf16.msra.mxu1 %v608_v9  ;;  %577 = vmatprep.subr.bf16.mxu0 %v640_v0 }
  0x15   :  { %555 = vmatprep.subr.bf16.mxu1 %v640_v0 }
  0x18   :  { %556 = vmatpush3.bf16.msra.mxu1 %v609_v10 }
  0x19   :  { %557 = vmatprep.subr.bf16.mxu1 %v640_v0 }
  0x1c   :  { %558 = vmatpush3.bf16.msra.mxu1 %v610_v11 }
  0x1d   :  { %559 = vmatprep.subr.bf16.mxu1 %v640_v0 }
  0x20   :  { %560 = vmatpush3.bf16.msra.mxu1 %v611_v12 }
  0x21   :  { %589 = vmatprep.subr.bf16.mxu1 %v640_v0 }
  0xd9   :  { %v95_v14 = vpop.f32.mrb[0].mxu0 }
  0xda   :  { %v96_v15 = vadd.f32 %v483_v13, %v95_v14  ;;  %v543_v16 = vpop.f32.mrb[1].mxu0 }
  0xdb   :  { %v98_v17 = vpop.f32.mrb[2].mxu0 }
  0xdc   :  { %v99_v18 = vadd.f32 %v483_v13, %v98_v17  ;;  %v544_v19 = vpop.f32.mrb[3].mxu0  ;;  %624 = vtanh.f32 %v96_v15 }
  0xde   :  { %626 = vtanh.f32 %v99_v18 }
  0xe6   :  { %v625_v20 = vpop.eup %624 }
  0xe8   :  { %v627_v21 = vpop.eup %626 }
  0xe9   :  { %v104_v22 = vpack.c.bf16 %v627_v21, %v625_v20 }
  0xeb   :  { %562 = vmatmul.mubr.bf16.vlgmr.msra.gmra.mrb[0].mxu1 %v104_v22 }
  0xec   :  { %597 = vmatprep.mubr.msk.bf16.mxu1 %vm641_vm0, %v640_v0  ;;  %590 = vmatpush3.bf16.msra.mxu1 %v620_v51 }
  0xed   :  { %591 = vmatprep.subr.bf16.mxu1 %v640_v0 }
  0xf0   :  { %592 = vmatpush3.bf16.msra.mxu1 %v621_v52 }
  0xf1   :  { %593 = vmatprep.subr.bf16.mxu1 %v640_v0 }
  0xf4   :  { %594 = vmatpush3.bf16.msra.mxu1 %v622_v53 }
  0xf5   :  { %595 = vmatprep.subr.bf16.mxu1 %v640_v0 }
  0xf8   :  { %596 = vmatpush3.bf16.msra.mxu1 %v623_v54 }
 0x1be   :  { %v210_v28 = vpop.f32.mrb[0].mxu1 }
 0x1bf   :  { %v211_v29 = vadd.f32 %v486_v27, %v210_v28  ;;  %v563_v30 = vpop.f32.mrb[1].mxu1 }
 0x1c0   :  { %v213_v31 = vpop.f32.mrb[2].mxu1 }
 0x1c1   :  { %v214_v32 = vadd.f32 %v486_v27, %v213_v31  ;;  %v564_v33 = vpop.f32.mrb[3].mxu1  ;;  %628 = vtanh.f32 %v211_v29 }
 0x1c3   :  { %630 = vtanh.f32 %v214_v32 }
 0x1cb   :  { %v629_v34 = vpop.eup %628 }
 0x1cd   :  { %v631_v35 = vpop.eup %630 }
 0x1ce   :  { %v219_v36 = vpack.c.bf16 %v631_v35, %v629_v34 }
 0x1d0   :  { %574 = vmatmul.mubr.msk.bf16.vlgmr.msra.gmra.mrb[4].mxu0 %vm259_vm2, %v219_v36 }
 0x1d1   :  { %585 = vmatprep.mubr.msk.bf16.mxu0 %vm641_vm0, %v640_v0  ;;  %578 = vmatpush3.bf16.msra.mxu0 %v616_v37 }
 0x1d2   :  { %579 = vmatprep.subr.bf16.mxu0 %v640_v0 }
 0x1d5   :  { %580 = vmatpush3.bf16.msra.mxu0 %v617_v38 }
 0x1d6   :  { %581 = vmatprep.subr.bf16.mxu0 %v640_v0 }
 0x1d9   :  { %582 = vmatpush3.bf16.msra.mxu0 %v618_v39 }
 0x1da   :  { %583 = vmatprep.subr.bf16.mxu0 %v640_v0  ;;  %v507_v0 = vld [vmem:[%s836_s10] ss:$0 sm:$0xff] }
 0x1dd   :  { %584 = vmatpush3.bf16.msra.mxu0 %v619_v40 }
 0x2a3   :  { %v297_v42 = vpop.f32.mrb[4].mxu0 }
 0x2a4   :  { %v298_v43 = vadd.f32 %v495_v41, %v297_v42  ;;  %v575_v44 = vpop.f32.mrb[5].mxu0 }
 0x2a5   :  { %v300_v45 = vpop.f32.mrb[6].mxu0 }
 0x2a6   :  { %v301_v46 = vadd.f32 %v495_v41, %v300_v45  ;;  %v576_v47 = vpop.f32.mrb[7].mxu0  ;;  %632 = vtanh.f32 %v298_v43 }
 0x2a8   :  { %634 = vtanh.f32 %v301_v46 }
 0x2b0   :  { %v633_v48 = vpop.eup %632 }
 0x2b2   :  { %v635_v49 = vpop.eup %634 }
 0x2b3   :  { %v306_v50 = vpack.c.bf16 %v635_v49, %v633_v48 }
 0x2b5   :  { %586 = vmatmul.mubr.msk.bf16.vlgmr.msra.gmra.mrb[8].mxu0 %vm259_vm2, %v306_v50 }
 0x388   :  { %v383_v56 = vpop.f32.mrb[8].mxu0 }
 0x389   :  { %v384_v57 = vadd.f32 %v501_v55, %v383_v56  ;;  %v587_v58 = vpop.f32.mrb[9].mxu0 }
 0x38a   :  { %v386_v59 = vpop.f32.mrb[10].mxu0 }
 0x38b   :  { %v387_v60 = vadd.f32 %v501_v55, %v386_v59  ;;  %v588_v61 = vpop.f32.mrb[11].mxu0  ;;  %636 = vtanh.f32 %v384_v57 }
 0x38d   :  { %638 = vtanh.f32 %v387_v60 }
 0x395   :  { %v637_v62 = vpop.eup %636 }
 0x397   :  { %v639_v63 = vpop.eup %638 }
 0x398   :  { %v392_v1 = vpack.c.bf16 %v639_v63, %v637_v62 }
 0x39a   :  { %598 = vmatmul.mubr.msk.bf16.vlgmr.msra.gmra.mrb[4].mxu1 %vm259_vm2, %v392_v1 }
 0x46d   :  { %v469_v2 = vpop.f32.mrb[4].mxu1 }
 0x46e   :  { %v470_v3 = vadd.f32 %v507_v0, %v469_v2  ;;  %v599_v4 = vpop.f32.mrb[5].mxu1 }
 0x46f   :  { %v472_v5 = vpop.f32.mrb[6].mxu1 }
 0x470   :  { %477 = vst.msk [vmem:[%s837_s11] sm:$0xff] %vm476_vm3, %v470_v3  ;;  %v473_v6 = vadd.f32 %v507_v0, %v472_v5  ;;  %v600_v7 = vpop.f32.mrb[7].mxu1 }
 0x472   :  { %478 = vst.msk [vmem:[%s837_s11 + $0x8] sm:$0xff] %vm476_vm3, %v473_v6 }

</bundles_post_ra>
